<compile_context>
chip_gen: v7x
topology: tpu7x:2x2x1
jax: 0.10.0
libtpu: 0.0.40
codegen_flags: <defaults>
</compile_context>

<pallas_src>
import jax
import jax.numpy as jnp
from jax import lax
from jax.experimental import pallas as pl
from jax.experimental.pallas import tpu as pltpu


def bow_kernel(ids_ref, emb_ref, w_ref, b_ref, out_ref):
    ids = ids_ref[...]                                   # [B, S] int32
    B, S = ids.shape
    Vp, D = emb_ref.shape                                # V padded to 128 lanes

    # Masked token counts: counts[b, v] = #{ s : ids[b, s] == v and ids[b, s] != 0 }
    # The PAD (id 0) mask is fused into the compare; no sign()/float multiply.
    iota_v = lax.broadcasted_iota(jnp.int32, (B, S, Vp), 2)
    hit = (ids[:, :, None] == iota_v) & (ids[:, :, None] != 0)   # [B, S, Vp] bool
    counts = jnp.sum(hit.astype(jnp.float32), axis=1)            # [B, Vp]  (2D, lane-major)

    # Sum of masked embeddings via one small MXU matmul, then mean + ReLU.
    # (relu(sum)/S == relu(mean) since S > 0; we scale before relu to keep the
    #  math literally identical to the module.)
    emb_sum = jnp.dot(counts, emb_ref[...],
                      preferred_element_type=jnp.float32)        # [B, D]
    emb_mean = emb_sum * (1.0 / S)
    emb_relu = jnp.maximum(emb_mean, 0.0)

    # Final linear layer into a lane-dense [B, Cp] slab (Cp = 128-padded C).
    logits = jnp.dot(emb_relu, w_ref[...],
                     preferred_element_type=jnp.float32) + b_ref[...]
    out_ref[...] = logits.astype(out_ref.dtype)


def simple_bow_forward(ids, emb_table, w, b):
    """ids: [B,S] int32; emb_table: [V,D] f32; w: [C,D] f32 (PyTorch layout); b: [C] f32."""
    B, S = ids.shape
    V, D = emb_table.shape
    C = w.shape[0]

    LANES = 128
    Vp = ((V + LANES - 1) // LANES) * LANES
    Cp = ((C + LANES - 1) // LANES) * LANES

    # Zero-pad vocab and class dims to 128 lanes (padded table rows never get
    # nonzero counts since ids < V; padded classes are sliced off below).
    emb_p = jnp.zeros((Vp, D), emb_table.dtype).at[:V, :].set(emb_table)
    w_t_p = jnp.zeros((D, Cp), w.dtype).at[:, :C].set(w.T)
    b_p = jnp.zeros((1, Cp), b.dtype).at[0, :C].set(b)

    out_p = pl.pallas_call(
        bow_kernel,
        out_shape=jax.ShapeDtypeStruct((B, Cp), jnp.float32),
        in_specs=[
            pl.BlockSpec(memory_space=pltpu.MemorySpace.VMEM),
            pl.BlockSpec(memory_space=pltpu.MemorySpace.VMEM),
            pl.BlockSpec(memory_space=pltpu.MemorySpace.VMEM),
            pl.BlockSpec(memory_space=pltpu.MemorySpace.VMEM),
        ],
        out_specs=pl.BlockSpec(memory_space=pltpu.MemorySpace.VMEM),
        compiler_params=pltpu.CompilerParams(vmem_limit_bytes=32 * 1024 * 1024),
    )(ids, emb_p, w_t_p, b_p)

    return out_p[:, :C]


if __name__ == "__main__":
    # Small, module-consistent shapes.
    B, S = 2, 8          # batch, sentence length
    V, D, C = 64, 32, 5  # nwords, embedding_dim, nclasses

    key = jax.random.PRNGKey(0)
    k_emb, k_w, k_b, k_ids = jax.random.split(key, 4)

    # Embedding init: uniform(-0.25, 0.25), row 0 (PAD) zeroed — as in __init__.
    emb_table = jax.random.uniform(k_emb, (V, D), jnp.float32, -0.25, 0.25)
    emb_table = emb_table.at[0].set(0.0)

    # nn.Linear default init: uniform(-1/sqrt(D), 1/sqrt(D)), PyTorch [C, D] layout.
    bound = 1.0 / jnp.sqrt(jnp.float32(D))
    w = jax.random.uniform(k_w, (C, D), jnp.float32, -bound, bound)
    b = jax.random.uniform(k_b, (C,), jnp.float32, -bound, bound)

    # Word ids, including some PAD (0) positions.
    ids = jax.random.randint(k_ids, (B, S), 0, V, dtype=jnp.int32)
    ids = ids.at[0, -2:].set(0)   # a couple of PAD tokens

    logits = simple_bow_forward(ids, emb_table, w, b)
    logits = jax.block_until_ready(logits)

    # Pure-JAX reference for sanity (mirrors the PyTorch forward in f32).
    emb = emb_table[ids]                                   # [B, S, D]
    emb = emb * jnp.sign(ids).astype(jnp.float32)[..., None]
    emb_mean = jnp.mean(emb, axis=1)
    emb_relu = jnp.maximum(emb_mean, 0.0)
    ref = emb_relu @ w.T + b

    assert logits.shape == (B, C)
    assert jnp.allclose(logits, ref, atol=1e-5, rtol=1e-5)
    print("KERNEL_OK")
</pallas_src>

<mosaic_0001>
module attributes {stable_mosaic.version = 11 : i64} {
  func.func @bow_kernel(%arg0: memref<2x8xi32, #tpu.memory_space<vmem>>, %arg1: memref<128x32xf32, #tpu.memory_space<vmem>>, %arg2: memref<32x128xf32, #tpu.memory_space<vmem>>, %arg3: memref<1x128xf32, #tpu.memory_space<vmem>>, %arg4: memref<2x128xf32, #tpu.memory_space<vmem>>) attributes {dimension_semantics = [], scalar_prefetch = 0 : i64, scratch_operands = 0 : i64, tpu.core_type = #tpu.core_type<tc>} {
    %c0 = arith.constant 0 : index
    %c0_0 = arith.constant 0 : index
    %0 = vector.load %arg0[%c0, %c0_0] : memref<2x8xi32, #tpu.memory_space<vmem>>, vector<2x8xi32>
    %1 = tpu.iota {dimensions = array<i32: 2>} : vector<2x8x128xi32>
    %2 = vector.shape_cast %0 : vector<2x8xi32> to vector<2x8x1xi32>
    %3 = vector.broadcast %2 : vector<2x8x1xi32> to vector<2x8x128xi32>
    %4 = arith.cmpi eq, %3, %1 : vector<2x8x128xi32>
    %5 = vector.shape_cast %0 : vector<2x8xi32> to vector<2x8x1xi32>
    %c0_i32 = arith.constant 0 : i32
    %6 = vector.broadcast %c0_i32 : i32 to vector<2x8x1xi32>
    %7 = arith.cmpi ne, %5, %6 : vector<2x8x1xi32>
    %8 = vector.broadcast %7 : vector<2x8x1xi1> to vector<2x8x128xi1>
    %9 = arith.andi %4, %8 : vector<2x8x128xi1>
    %10 = arith.extui %9 : vector<2x8x128xi1> to vector<2x8x128xi32>
    %11 = arith.sitofp %10 : vector<2x8x128xi32> to vector<2x8x128xf32>
    %cst = arith.constant dense<0.000000e+00> : vector<2x128xf32>
    %12 = vector.multi_reduction <add>, %11, %cst [1] : vector<2x8x128xf32> to vector<2x128xf32>
    %c0_1 = arith.constant 0 : index
    %c0_2 = arith.constant 0 : index
    %13 = vector.load %arg1[%c0_1, %c0_2] : memref<128x32xf32, #tpu.memory_space<vmem>>, vector<128x32xf32>
    %cst_3 = arith.constant dense<0.000000e+00> : vector<2x32xf32>
    %14 = tpu.matmul %12, %13, %cst_3 {dimension_numbers = #tpu.dot_dimension_numbers<[1], [0], [0], [1], [0, 0, 1, 1], [], []>} : vector<2x128xf32>, vector<128x32xf32>, vector<2x32xf32> -> vector<2x32xf32>
    %cst_4 = arith.constant 1.250000e-01 : f32
    %15 = vector.broadcast %cst_4 : f32 to vector<2x32xf32>
    %16 = arith.mulf %14, %15 : vector<2x32xf32>
    %cst_5 = arith.constant 0.000000e+00 : f32
    %17 = vector.broadcast %cst_5 : f32 to vector<2x32xf32>
    %18 = arith.maximumf %16, %17 : vector<2x32xf32>
    %c0_6 = arith.constant 0 : index
    %c0_7 = arith.constant 0 : index
    %19 = vector.load %arg2[%c0_6, %c0_7] : memref<32x128xf32, #tpu.memory_space<vmem>>, vector<32x128xf32>
    %cst_8 = arith.constant dense<0.000000e+00> : vector<2x128xf32>
    %20 = tpu.matmul %18, %19, %cst_8 {dimension_numbers = #tpu.dot_dimension_numbers<[1], [0], [0], [1], [0, 0, 1, 1], [], []>} : vector<2x32xf32>, vector<32x128xf32>, vector<2x128xf32> -> vector<2x128xf32>
    %c0_9 = arith.constant 0 : index
    %c0_10 = arith.constant 0 : index
    %21 = vector.load %arg3[%c0_9, %c0_10] : memref<1x128xf32, #tpu.memory_space<vmem>>, vector<1x128xf32>
    %22 = vector.broadcast %21 : vector<1x128xf32> to vector<2x128xf32>
    %23 = arith.addf %20, %22 : vector<2x128xf32>
    %c0_11 = arith.constant 0 : index
    %c0_12 = arith.constant 0 : index
    %24 = vector.load %arg4[%c0_11, %c0_12] : memref<2x128xf32, #tpu.memory_space<vmem>>, vector<2x128xf32>
    tpu.vector_store %arg4[%c0_11, %c0_12], %23 {strides = array<i32>} : memref<2x128xf32, #tpu.memory_space<vmem>>, vector<2x128xf32>,
    return
  }
}

</mosaic_0001>

<bundles_post_ra>
// kernel: tpu_custom_call.1
= control target key start
LH: loop header
LB: loop body
LE: loop exit
PB: predicated region body
PF: predicated region fallthrough
CT: control target
= control target key end

     0   :  { %v19_v0 = vlaneseq  ;;  %v384_v3 = vmov 0.0|0.0   ;;  %s491_s0 = inlined_call_operand.vmem [shape: s32[2,8], index: 0, kind: input, shape index: {}]   ;;  %s492_s1 = inlined_call_operand.vmem [shape: f32[128,32], index: 1, kind: input, shape index: {}]   ;;  %s493_s2 = inlined_call_operand.vmem [shape: f32[32,128], index: 2, kind: input, shape index: {}]   ;;  %s494_s3 = inlined_call_operand.vmem [shape: f32[1,128], index: 3, kind: input, shape index: {}]   ;;  %s495_s4 = inlined_call_operand.hbm [shape: f32[2,128], index: 4, kind: output, shape index: {}]  }
   0x1   :  { %v61_v1 = vld [vmem:[%s492_s1] sm:$0xff]  ;;  %v62_v2 = vld [vmem:[%s492_s1 + $0x8] sm:$0xff]  ;;  %326 = vmatprep.subr.bf16.mxu0 %v384_v3  ;;  %v63_v5 = vld [vmem:[%s492_s1 + $0x10] sm:$0xff]  ;;  %350 = vmatprep.subr.bf16.mxu1 %v384_v3 }
   0x2   :  { %v327_v4 = vpack.c.bf16 %v62_v2, %v61_v1  ;;  %v64_v6 = vld [vmem:[%s492_s1 + $0x18] sm:$0xff]  ;;  %v22_v7 = vshrl.u32 %v19_v0, 7  ;;  %v18_v8 = vld [vmem:[%s491_s0] sm:$0x3]  ;;  %v66_v13 = vld [vmem:[%s492_s1 + $0x28] sm:$0xff] }
   0x3   :  { %v330_v9 = vpack.c.bf16 %v64_v6, %v63_v5  ;;  %v65_v12 = vld [vmem:[%s492_s1 + $0x20] sm:$0xff] }
   0x4   :  { %328 = vmatpush3.bf16.msra.mxu0 %v327_v4  ;;  %v23_v10 = vsub.s32 0, %v22_v7  ;;  %v30_v11 = vsub.s32 1, %v22_v7 }
   0x5   :  { %329 = vmatprep.subr.bf16.mxu0 %v384_v3 }
   0x6   :  { %9 = vsyncpa [#allocation3], 0  ;;  %v24_v14 = vrot.slane %v18_v8, %v23_v10  ;;  %v333_v15 = vpack.c.bf16 %v66_v13, %v65_v12  ;;  %v31_v16 = vrot.slane %v18_v8, %v30_v11  ;;  %v67_v17 = vld [vmem:[%s492_s1 + $0x30] sm:$0xff]  ;;  %v68_v18 = vld [vmem:[%s492_s1 + $0x38] sm:$0xff]  ;;  %vm385_vm0 = vmmov 0   ;;  %s387_s30 = smov [#allocation2]  }
   0x7   :  { %v336_v19 = vpack.c.bf16 %v68_v18, %v67_v17  ;;  %v386_v20 = vmov 0.0   ;;  %v69_v21 = vld [vmem:[%s492_s1 + $0x40] sm:$0xff]  ;;  %v70_v22 = vld [vmem:[%s492_s1 + $0x48] sm:$0xff]  ;;  %v71_v26 = vld [vmem:[%s492_s1 + $0x50] sm:$0xff]  ;;  %v20_v36 = vand.u32 127, %v19_v0  ;;  %vm79_vm7 = vcmask 1041409  }
   0x8   :  { %331 = vmatpush3.bf16.msra.mxu0 %v330_v9  ;;  %26 = vbcast.lane.b32.xlu0 %v24_v14, 256  ;;  %v339_v23 = vpack.c.bf16 %v70_v22, %v69_v21  ;;  %v154_v24 = vld [vmem:[%s493_s2] sm:$0xff]  ;;  %v155_v25 = vld [vmem:[%s493_s2 + $0x8] sm:$0xff]  ;;  %v72_v27 = vld [vmem:[%s492_s1 + $0x58] sm:$0xff]  ;;  %vm165_vm8 = vcmask 261120   ;;  %s246_s5 = sshll.u32 %s387_s30, 4  ;;  %s247_s5 = int_to_ptr.vmem [resolvable:$true] %s246_s5 }
   0x9   :  { %332 = vmatprep.subr.bf16.mxu0 %v384_v3  ;;  %312 = vmatprep.mubr.msk.f32.mxu0 %vm385_vm0, %v386_v20  ;;  %v351_v28 = vpack.c.bf16 %v155_v25, %v154_v24  ;;  %v342_v29 = vpack.c.bf16 %v72_v27, %v71_v26  ;;  %v73_v30 = vld [vmem:[%s492_s1 + $0x60] sm:$0xff]  ;;  %v74_v31 = vld [vmem:[%s492_s1 + $0x68] sm:$0xff]  ;;  %v75_v33 = vld [vmem:[%s492_s1 + $0x70] sm:$0xff]  ;;  %p365_p1 = scmp.lt.s32.totalorder %s247_s5, %s247_s5 }
   0xa   :  { %323 = vmatprep.mubr.msk.f32.mxu1 %vm385_vm0, %v386_v20  ;;  %v345_v32 = vpack.c.bf16 %v74_v31, %v73_v30  ;;  %v76_v34 = vld [vmem:[%s492_s1 + $0x78] sm:$0xff]  ;;  %v156_v54 = vld [vmem:[%s493_s2 + $0x10] sm:$0xff]  ;;  %v256_v61 = vld [vmem:[%s494_s3] ss:$0 sm:$0xff] }
   0xb   :  { %352 = vmatpush3.bf16.msra.mxu1 %v351_v28  ;;  %v348_v35 = vpack.c.bf16 %v76_v34, %v75_v33  ;;  %v157_v55 = vld [vmem:[%s493_s2 + $0x18] sm:$0xff]  ;;  %s360_s2 = scalar_lea.vmem %s247_s5, 32 }
   0xc   :  { %334 = vmatpush3.bf16.msra.mxu0 %v333_v15  ;;  %33 = vbcast.lane.b32.xlu0 %v31_v16, 256  ;;  %v354_v56 = vpack.c.bf16 %v157_v55, %v156_v54  ;;  %p361_p0 = scmp.ne.s32.totalorder %s247_s5, %s360_s2  ;;  %p366_p2 = scmp.lt.s32.totalorder %s360_s2, %s360_s2 }
   0xd   :  { %335 = vmatprep.subr.bf16.mxu0 %v384_v3  ;;  %353 = vmatprep.subr.bf16.mxu1 %v384_v3 }
   0xe   :  { %p367_p3 = por %p366_p2, %p365_p1 }
   0xf   :  { %355 = vmatpush3.bf16.msra.mxu1 %v354_v56 }
  0x10   :  { %337 = vmatpush3.bf16.msra.mxu0 %v336_v19  ;;  %p368_p4 = pnand %p367_p3, %p361_p0 }
  0x11   :  { %338 = vmatprep.subr.bf16.mxu0 %v384_v3 }
  0x14   :  { %340 = vmatpush3.bf16.msra.mxu0 %v339_v23 }
  0x15   :  { %341 = vmatprep.subr.bf16.mxu0 %v384_v3 }
  0x18   :  { %343 = vmatpush3.bf16.msra.mxu0 %v342_v29 }
  0x19   :  { %344 = vmatprep.subr.bf16.mxu0 %v384_v3 }
  0x1c   :  { %346 = vmatpush3.bf16.msra.mxu0 %v345_v32 }
  0x1d   :  { %347 = vmatprep.subr.bf16.mxu0 %v384_v3 }
  0x20   :  { %349 = vmatpush3.bf16.msra.mxu0 %v348_v35 }
  0x7a   :  { %v27_v37 = vpop.permute.xlu0 %26 }
  0x7b   :  { %vm35_vm1 = vcmp.eq.s32.totalorder %v27_v37, %v20_v36  ;;  %vm37_vm2 = vcmp.ne.s32.totalorder %v27_v37, 0 }
  0x7c   :  { %vm43_vm3 = vmand %vm35_vm1, %vm37_vm2 }
  0x7d   :  { %v254_v38 = vsel %vm43_vm3, 1.0, %v386_v20 }
  0x7e   :  { %v49_v39 = vrot.slane %v254_v38, 4  ;;  %v34_v40 = vpop.permute.xlu0 %33 }
  0x7f   :  { %vm36_vm4 = vcmp.eq.s32.totalorder %v34_v40, %v20_v36  ;;  %vm38_vm5 = vcmp.ne.s32.totalorder %v34_v40, 0 }
  0x80   :  { %vm44_vm6 = vmand %vm36_vm4, %vm38_vm5  ;;  %v50_v41 = vadd.f32 %v254_v38, %v49_v39 }
  0x81   :  { %v255_v42 = vsel %vm44_vm6, 1.0, %v386_v20 }
  0x82   :  { %v55_v43 = vrot.slane %v255_v42, 4  ;;  %v51_v44 = vrot.slane %v50_v41, 2 }
  0x84   :  { %v56_v45 = vadd.f32 %v255_v42, %v55_v43  ;;  %v52_v46 = vadd.f32 %v51_v44, %v50_v41 }
  0x86   :  { %v57_v47 = vrot.slane %v56_v45, 2  ;;  %v53_v49 = vrot.slane %v52_v46, 1 }
  0x88   :  { %v58_v48 = vadd.f32 %v57_v47, %v56_v45  ;;  %v54_v51 = vadd.f32 %v53_v49, %v52_v46 }
  0x8a   :  { %v59_v50 = vrot.slane %v58_v48, 1 }
  0x8c   :  { %v60_v52 = vadd.f32 %v59_v50, %v58_v48 }
  0x8e   :  { %v80_v53 = vsel %vm79_vm7, %v60_v52, %v54_v51 }
  0x8f   :  { %313 = vmatmul.mubr.f32.vlgmr.msra.gmra.mrb[0].mxu0 %v80_v53 }
 0x162   :  { %v148_v57 = vpop.f32.mrb[0].mxu0 }
 0x163   :  { %v152_v58 = vmul.f32 0.125, %v148_v57  ;;  %v314_v59 = vpop.f32.mrb[1].mxu0 }
 0x165   :  { %v153_v60 = vmax.f32 %v152_v58, 0.0 }
 0x167   :  { %324 = vmatmul.mubr.msk.f32.vlgmr.msra.gmra.mrb[0].mxu1 %vm165_vm8, %v153_v60 }
 0x23a   :  { %v235_v62 = vpop.f32.mrb[0].mxu1 }
 0x23b   :  { %v236_v63 = vadd.f32 %v256_v61, %v235_v62  ;;  %v325_v0 = vpop.f32.mrb[1].mxu1 }
 0x23d   :  { %239 = vst [vmem:[#allocation2] sm:$0x3] %v236_v63 }
 0x23e   :  { %371 = shalt.err (!%p368_p4)
}
 0x23f   :  { %s372_s8 = scalar_lea.hbm %s495_s4, 32 }
 0x240   :  { %p373_p5 = scmp.ne.s32.totalorder %s495_s4, %s372_s8  ;;  %p376_p6 = scmp.lt.u32.totalorder %s372_s8, %s495_s4 }
 0x242   :  { %p378_p7 = pnand %p376_p6, %p373_p5 }
 0x244   :  { %381 = shalt.err (!%p378_p7)
}
 0x245   :  { %249 = dma.vmem_to_hbm [thread:$0]  %s247_s5, 32, %s495_s4, [#allocation3]  }
 0x246   :  { %382 = dma.done.wait [#allocation3], 32  }
 0x247   :  { %383 = vsyncadd [#allocation3], 4294967264 }
 0x248   :  { %253 = vsyncpa [#allocation3], 1 }

</bundles_post_ra>
